<compile_context>
chip_gen: v5e
topology: v5e:2x2
jax: 0.10.0
libtpu: 0.0.40
codegen_flags: <defaults>
</compile_context>

<pallas_src>
import functools

import jax
import jax.numpy as jnp
from jax.experimental import pallas as pl
from jax.experimental.pallas import tpu as pltpu


# ---------------------------------------------------------------------------
# Pallas kernel: row-wise normalization + speaker-conditioned affine
# ---------------------------------------------------------------------------
def _scln_kernel(x_ref, beta_ref, gamma_ref, out_ref, *, eps):
    x = x_ref[0].astype(jnp.float32)          # (tT, H)
    H = x.shape[-1]

    # torch.std is unbiased -> divide by H-1; eps is added to sigma (not var).
    mu = jnp.mean(x, axis=-1, keepdims=True)
    diff = x - mu
    var = jnp.sum(diff * diff, axis=-1, keepdims=True) * (1.0 / (H - 1))
    sigma = jnp.sqrt(var)
    inv = pl.reciprocal(sigma + eps, approx=False)    # EUP/exact; cheaper than broadcast divide
    y = diff * inv

    beta = beta_ref[0].astype(jnp.float32)    # (1, H), broadcasts over rows
    gamma = gamma_ref[0].astype(jnp.float32)  # (1, H)

    out_ref[0] = (gamma * y + beta).astype(out_ref.dtype)


# ---------------------------------------------------------------------------
# Wrapper
# ---------------------------------------------------------------------------
def scln_pallas(x, s, w_t, hidden_size, eps=1e-8, t_tile=None):
    """x: (B, T, H); s: (B, 1, S) or (B, S); w_t: (S, 2H) (= torch W.T)."""
    B, T, H = x.shape
    assert H == hidden_size
    assert H >= 2, "unbiased std requires hidden_size >= 2"
    if s.ndim == 2:
        s = s[:, None, :]

    # ---- Hoist the speaker affine out of the grid loop: one XLA matmul. ----
    bg = jnp.einsum(
        "bls,sh->blh",
        s.astype(jnp.float32),
        w_t.astype(jnp.float32),
    )                                           # (B, 1, 2H) f32
    beta = bg[..., :H]                          # (B, 1, H)
    gamma = bg[..., H:]                         # (B, 1, H)

    # ---- T-tile selection by VMEM byte budget (generation-conservative). ----
    # Per-tile budget ~3 MiB so that double-buffered in+out tiles (+temps)
    # stay well under the v5e 16 MiB scoped default (and v6e/v7x 32 MiB).
    if t_tile is None:
        itemsize = jnp.dtype(x.dtype).itemsize
        per_tile_budget = 3 * 1024 * 1024
        max_rows = max(8, (per_tile_budget // (H * itemsize)) // 8 * 8)
        if T <= max_rows:
            t_tile = T                          # full extent (always legal)
        else:
            t_tile = max_rows                   # multiple of 8; cdiv handles tail
        # v7x megacore: with a single batch, split T so both cores get work.
        if B == 1 and T >= 16 and t_tile >= T:
            t_tile = max(8, ((T + 1) // 2 + 7) // 8 * 8)
            if t_tile >= T:                     # guard tiny T
                t_tile = T
    n_t = pl.cdiv(T, t_tile)

    kernel = functools.partial(_scln_kernel, eps=eps)

    return pl.pallas_call(
        kernel,
        out_shape=jax.ShapeDtypeStruct((B, T, H), x.dtype),
        grid_spec=pltpu.PrefetchScalarGridSpec(
            num_scalar_prefetch=0,
            grid=(B, n_t),
            in_specs=[
                pl.BlockSpec((1, t_tile, H), lambda b, t: (b, t, 0)),   # x tile
                pl.BlockSpec((1, 1, H), lambda b, t: (b, 0, 0)),        # beta
                pl.BlockSpec((1, 1, H), lambda b, t: (b, 0, 0)),        # gamma
            ],
            out_specs=pl.BlockSpec((1, t_tile, H), lambda b, t: (b, t, 0)),
        ),
        compiler_params=pltpu.CompilerParams(
            dimension_semantics=("parallel", "parallel"),
            vmem_limit_bytes=32 * 1024 * 1024,
        ),
    )(x, beta, gamma)


# ---------------------------------------------------------------------------
# Pure-JAX reference (mirrors the PyTorch forward)
# ---------------------------------------------------------------------------
def scln_reference(x, s, w_t, hidden_size, eps=1e-8):
    if s.ndim == 2:
        s = s[:, None, :]
    mu = jnp.mean(x, axis=-1, keepdims=True)
    sigma = jnp.std(x, axis=-1, keepdims=True, ddof=1)    # unbiased, like torch
    y = (x - mu) / (sigma + eps)
    affine = jnp.einsum("bls,sh->blh", s, w_t)            # (B, 1, 2H)
    beta = affine[..., :hidden_size]
    gamma = affine[..., hidden_size:]
    return gamma * y + beta


# ---------------------------------------------------------------------------
# Main
# ---------------------------------------------------------------------------
if __name__ == "__main__":
    B, T, hidden, s_size = 2, 8, 32, 16

    key = jax.random.PRNGKey(0)
    kx, ks, kw = jax.random.split(key, 3)

    # Xavier-uniform init of the torch weight (2H, S); stored transposed (S, 2H)
    # so the affine computes s @ W^T directly (== torch Linear(s)).
    fan_in, fan_out = s_size, 2 * hidden
    bound = (6.0 / (fan_in + fan_out)) ** 0.5
    w_torch = jax.random.uniform(kw, (2 * hidden, s_size), jnp.float32,
                                 -bound, bound)
    w_t = jnp.asarray(w_torch.T)

    x = jax.random.normal(kx, (B, T, hidden), jnp.float32)
    s = jax.random.normal(ks, (B, 1, s_size), jnp.float32)

    out = scln_pallas(x, s, w_t, hidden)
    out = jax.block_until_ready(out)

    ref = scln_reference(x, s, w_t, hidden)
    assert out.shape == (B, T, hidden)
    assert jnp.allclose(out, ref, atol=1e-5, rtol=1e-5), "SCLN output mismatch"

    print("KERNEL_OK")
</pallas_src>

<mosaic_0001>
module attributes {stable_mosaic.version = 11 : i64} {
  func.func @_scln_kernel(%arg0: i32, %arg1: i32, %arg2: memref<1x8x32xf32, #tpu.memory_space<vmem>>, %arg3: memref<1x1x32xf32, #tpu.memory_space<vmem>>, %arg4: memref<1x1x32xf32, #tpu.memory_space<vmem>>, %arg5: memref<1x8x32xf32, #tpu.memory_space<vmem>>) attributes {dimension_semantics = [#tpu.dimension_semantics<parallel>, #tpu.dimension_semantics<parallel>], iteration_bounds = array<i64: 2, 1>, scalar_prefetch = 0 : i64, scratch_operands = 0 : i64, tpu.core_type = #tpu.core_type<tc>, window_params = [{transform_indices = @transform_0, window_bounds = array<i64: 1, 8, 32>}, {transform_indices = @transform_1, window_bounds = array<i64: 1, 1, 32>}, {transform_indices = @transform_2, window_bounds = array<i64: 1, 1, 32>}, {transform_indices = @transform_3, window_bounds = array<i64: 1, 8, 32>}]} {
    %c0 = arith.constant 0 : index
    %c0_0 = arith.constant 0 : index
    %c0_1 = arith.constant 0 : index
    %0 = vector.load %arg2[%c0, %c0_0, %c0_1] : memref<1x8x32xf32, #tpu.memory_space<vmem>>, vector<1x8x32xf32>
    %1 = vector.shape_cast %0 : vector<1x8x32xf32> to vector<8x32xf32>
    %cst = arith.constant dense<0.000000e+00> : vector<8xf32>
    %2 = vector.multi_reduction <add>, %1, %cst [1] : vector<8x32xf32> to vector<8xf32>
    %3 = vector.shape_cast %2 : vector<8xf32> to vector<8x1xf32>
    %cst_2 = arith.constant 3.200000e+01 : f32
    %4 = vector.broadcast %cst_2 : f32 to vector<8x1xf32>
    %5 = arith.divf %3, %4 : vector<8x1xf32>
    %6 = vector.broadcast %5 : vector<8x1xf32> to vector<8x32xf32>
    %7 = arith.subf %1, %6 : vector<8x32xf32>
    %8 = arith.mulf %7, %7 : vector<8x32xf32>
    %cst_3 = arith.constant dense<0.000000e+00> : vector<8xf32>
    %9 = vector.multi_reduction <add>, %8, %cst_3 [1] : vector<8x32xf32> to vector<8xf32>
    %10 = vector.shape_cast %9 : vector<8xf32> to vector<8x1xf32>
    %cst_4 = arith.constant 0.0322580636 : f32
    %11 = vector.broadcast %cst_4 : f32 to vector<8x1xf32>
    %12 = arith.mulf %10, %11 : vector<8x1xf32>
    %13 = math.sqrt %12 : vector<8x1xf32>
    %cst_5 = arith.constant 9.99999993E-9 : f32
    %14 = vector.broadcast %cst_5 : f32 to vector<8x1xf32>
    %15 = arith.addf %13, %14 : vector<8x1xf32>
    %16 = tpu.reciprocal %15 : vector<8x1xf32> -> vector<8x1xf32>
    %17 = vector.broadcast %16 : vector<8x1xf32> to vector<8x32xf32>
    %18 = arith.mulf %7, %17 : vector<8x32xf32>
    %c0_6 = arith.constant 0 : index
    %c0_7 = arith.constant 0 : index
    %c0_8 = arith.constant 0 : index
    %19 = vector.load %arg3[%c0_6, %c0_7, %c0_8] : memref<1x1x32xf32, #tpu.memory_space<vmem>>, vector<1x1x32xf32>
    %20 = vector.shape_cast %19 : vector<1x1x32xf32> to vector<1x32xf32>
    %c0_9 = arith.constant 0 : index
    %c0_10 = arith.constant 0 : index
    %c0_11 = arith.constant 0 : index
    %21 = vector.load %arg4[%c0_9, %c0_10, %c0_11] : memref<1x1x32xf32, #tpu.memory_space<vmem>>, vector<1x1x32xf32>
    %22 = vector.shape_cast %21 : vector<1x1x32xf32> to vector<1x32xf32>
    %23 = vector.broadcast %22 : vector<1x32xf32> to vector<8x32xf32>
    %24 = arith.mulf %23, %18 : vector<8x32xf32>
    %25 = vector.broadcast %20 : vector<1x32xf32> to vector<8x32xf32>
    %26 = arith.addf %24, %25 : vector<8x32xf32>
    %c0_12 = arith.constant 0 : index
    %c0_13 = arith.constant 0 : index
    %c0_14 = arith.constant 0 : index
    %27 = vector.load %arg5[%c0_12, %c0_13, %c0_14] : memref<1x8x32xf32, #tpu.memory_space<vmem>>, vector<1x8x32xf32>
    %28 = vector.shape_cast %27 : vector<1x8x32xf32> to vector<8x32xf32>
    %29 = vector.shape_cast %26 : vector<8x32xf32> to vector<1x8x32xf32>
    tpu.vector_store %arg5[%c0_12, %c0_13, %c0_14], %29 {strides = array<i32>} : memref<1x8x32xf32, #tpu.memory_space<vmem>>, vector<1x8x32xf32>,
    return
  }
  func.func @transform_0(%arg0: i32, %arg1: i32) -> (i32, i32, i32) {
    %c0_i32 = arith.constant 0 : i32
    %c0_i32_0 = arith.constant 0 : i32
    return %arg0, %arg1, %c0_i32 : i32, i32, i32
  }
  func.func @transform_1(%arg0: i32, %arg1: i32) -> (i32, i32, i32) {
    %c0_i32 = arith.constant 0 : i32
    %c0_i32_0 = arith.constant 0 : i32
    %c0_i32_1 = arith.constant 0 : i32
    return %arg0, %c0_i32, %c0_i32_0 : i32, i32, i32
  }
  func.func @transform_2(%arg0: i32, %arg1: i32) -> (i32, i32, i32) {
    %c0_i32 = arith.constant 0 : i32
    %c0_i32_0 = arith.constant 0 : i32
    %c0_i32_1 = arith.constant 0 : i32
    return %arg0, %c0_i32, %c0_i32_0 : i32, i32, i32
  }
  func.func @transform_3(%arg0: i32, %arg1: i32) -> (i32, i32, i32) {
    %c0_i32 = arith.constant 0 : i32
    %c0_i32_0 = arith.constant 0 : i32
    return %arg0, %arg1, %c0_i32 : i32, i32, i32
  }
}

</mosaic_0001>

<bundles_post_ra>
// kernel: tpu_custom_call.1
= control target key start
LH: loop header
LB: loop body
LE: loop exit
PB: predicated region body
PF: predicated region fallthrough
CT: control target
= control target key end

     0   :  { %s922_s0 = inlined_call_operand.hbm [shape: f32[2,8,32], index: 0, kind: input, shape index: {}]   ;;  %s923_s1 = inlined_call_operand.hbm [shape: f32[2,1,32], index: 1, kind: input, shape index: {}]   ;;  %s924_s2 = inlined_call_operand.hbm [shape: f32[2,1,32], index: 2, kind: input, shape index: {}]   ;;  %s925_s3 = inlined_call_operand.hbm [shape: f32[2,8,32], index: 3, kind: output, shape index: {}]  }
   0x1   :  { %928 = sst [smem:[#allocation15_spill]] %s923_s1 }
   0x2   :  { %8 = vsyncpa [#allocation3], 0 }
   0x3   :  { %10 = vsyncpa [#allocation3 + $0x1], 0 }
   0x4   :  { %11 = vsyncpa [#allocation6], 0 }
   0x5   :  { %13 = vsyncpa [#allocation6 + $0x1], 0 }
   0x6   :  { %14 = vsyncpa [#allocation4], 0 }
   0x7   :  { %16 = vsyncpa [#allocation4 + $0x1], 0  ;;  %s755_s12 = smov 0   ;;  %s757_s13 = smov 0  }
   0x8   :  { %s759_s14 = smov 0   ;;  %s761_s15 = smov 0  }
   0x9   :  { %s763_s16 = smov 0   ;;  %s765_s17 = smov 0  }
   0xa LB: > { %929 = sst [smem:[#allocation12_spill]] %s720_s14  ;;  %s786_s18 = sadd.s32 4294967295, %s732_s17   ;;  %s732_s17 = sphi %s765_s17, %s22_s17   ;;  %s728_s16 = sphi %s763_s16, %s945_s16   ;;  %s724_s15 = sphi %s761_s15, %s944_s15   ;;  %s720_s14 = sphi %s759_s14, %s940_s14   ;;  %s716_s13 = sphi %s757_s13, %s943_s13   ;;  %s712_s12 = sphi %s755_s12, %s942_s12  }
   0xb   : > { %s463_s19 = sadd.s32 4294967294, %s732_s17   ;;  %s34_s20 = sadd.s32 1, %s728_s16 }
   0xc   : > { %s43_s21 = sadd.s32 1, %s720_s14  ;;  %p36_p0 = scmp.ge.s32.totalorder %s34_s20, 2 }
   0xd   : > { %p50_p1 = scmp.ne.s32.totalorder %s720_s14, %s716_s13  ;;  %p51_p2 = scmp.eq.s32.totalorder %s732_s17, 0 }
   0xe   : > { %p56_p3 = scmp.ne.s32.totalorder %s716_s13, %s712_s12  ;;  %s947_s20 = smov (%p36_p0, %s34_s20), 0 }
   0xf   : > { %930 = sst [smem:[#allocation13_spill]] %s947_s20  ;;  %p798_p4 = por %p51_p2, %p50_p1 }
  0x10   : > { %p57_p5 = scmp.eq.s32.totalorder %s786_s18, 0  ;;  %s38_s23 = ssub.s32 %s728_s16, %s947_s20 }
  0x11   : > { %p134_p6 = scmp.eq.s32.totalorder %s786_s18, 1  ;;  %p41_p7 = scmp.eq.s32.totalorder %s38_s23, 0 }
  0x12   : > { %p806_p8 = por %p57_p5, %p56_p3  ;;  %p140_p10 = scmp.eq.s32.totalorder %s463_s19, 1 }
  0x13   : > { %p810_p9 = por %p134_p6, %p50_p1  ;;  %p465_p12 = scmp.ge.s32.totalorder %s732_s17, 2 }
  0x14   : > { %s815_s26 = scalar_select %p41_p7, %s720_s14, %s43_s21  }
  0x15   : > { %p817_p11 = por %p140_p10, %p56_p3  ;;  %p497_p13 = scmp.lt.s32.totalorder %s732_s17, 2 }
  0x16   : > { %934 = sst [smem:[#allocation14_spill]] %s815_s26  ;;  %s160_s28 = sand.u32 1, %s720_s14  }
  0x17   : > { %s180_s29 = sand.u32 1, %s732_s17   ;;  %p827_p0 = pnand %p497_p13, %p798_p4 }
  0x18   : > { %s937_s1 = sld [smem:[#allocation15_spill]]  ;;  %s183_s7 = scalar_lea.vmem [#allocation5], %s160_s28 }
  0x19   : > { %s190_s8 = sshll.u32 %s183_s7, 4  ;;  %s181_s10 = scalar_lea.sflag [#allocation6], %s180_s29  ;;  %s191_s8 = int_to_ptr.vmem [resolvable:$true] %s190_s8 }
  0x1a   : > { %p468_p1 = scmp.ge.s32.totalorder %s732_s17, 1  ;;  %p212_p2 = scmp.lt.s32.totalorder %s732_s17, 3 }
  0x1b   : > { %s466_s19 = sshll.u32 %s160_s28, 3  ;;  %s467_s21 = sshll.u32 %s728_s16, 3 }
  0x1c   : > { %p839_p3 = pnand %p468_p1, %p212_p2  ;;  %s169_s4 = scalar_lea.hbm %s922_s0, %s467_s21 }
  0x1d   : > { %s171_s5 = sshll.u32 %s169_s4, 4  ;;  %s161_s29 = scalar_lea.sflag [#allocation3], %s160_s28  ;;  %s172_s5 = int_to_ptr.hbm [resolvable:$true] %s171_s5 }
  0x1e   : > { %s186_s6 = scalar_lea.hbm %s937_s1, %s728_s16  ;;  %s203_s1 = scalar_lea.hbm %s924_s2, %s728_s16 }
  0x1f   : > { %s188_s9 = sshll.u32 %s186_s6, 4  ;;  %s164_s6 = scalar_lea.vmem [#allocation2], %s466_s19  ;;  %s189_s9 = int_to_ptr.hbm [resolvable:$true] %s188_s9 }
  0x20   : > { %489 = dma.hbm_to_vmem [thread:$0]  (!%p827_p0), %s189_s9, 16, %s191_s8, %s181_s10  }
  0x21   : > { %s173_s7 = sshll.u32 %s164_s6, 4  ;;  %s205_s20 = sshll.u32 %s203_s1, 4  ;;  %s174_s7 = int_to_ptr.vmem [resolvable:$true] %s173_s7  ;;  %s206_s20 = int_to_ptr.hbm [resolvable:$true] %s205_s20 }
  0x22   : > { %486 = dma.hbm_to_vmem [thread:$0]  (!%p827_p0), %s172_s5, 128, %s174_s7, %s161_s29  }
  0x23   : > { %s200_s26 = scalar_lea.vmem [#allocation7], %s160_s28  ;;  %216 = sbr.rel (%p839_p3) target bundleno = 336 (0x150), region = 32 }
  0x24   : > { %s207_s14 = sshll.u32 %s200_s26, 4  ;;  %s858_s19 = sand.u32 (!%p839_p3), 1, %s716_s13   ;;  %s208_s14 = int_to_ptr.vmem [resolvable:$true] %s207_s14 }
  0x25   : > { %492 = dma.hbm_to_vmem [thread:$0]  (!%p827_p0), %s206_s20, 16, %s208_s14, %s181_s10  }
  0x26   : > { %s469_s21 = sshll.u32 (!%p839_p3), %s858_s19, 3  ;;  %s219_s22 = scalar_lea.sflag (!%p839_p3), [#allocation3], %s858_s19 }
  0x27   : > { %s222_s1 = scalar_lea.vmem (!%p839_p3), [#allocation2], %s469_s21 }
  0x28   : > { %699 = dma.done.wait (%p806_p8), %s219_s22, 128  }
  0x29   : > { %701 = vsyncadd (%p806_p8), %s219_s22, 4294967168  ;;  %s228_s14 = sand.u32 1, %s786_s18   ;;  %s231_s26 = scalar_lea.vmem [#allocation5], %s858_s19 }
  0x2a   : > { %s229_s20 = scalar_lea.sflag [#allocation6], %s228_s14 }
  0x2b   : > { %703 = dma.done.wait (%p806_p8), %s229_s20, 32  }
  0x2c   : > { %705 = vsyncadd (%p806_p8), %s229_s20, 4294967264  ;;  %vm273_vm0 = vcmask 261120   ;;  %v272_v0 = vld [vmem:[%s222_s1] sm:$0xff]  ;;  %v734_v2 = vmov 32.0   ;;  %s240_s18 = scalar_lea.vmem [#allocation7], %s858_s19  ;;  %s472_s24 = sshll.u32 %s724_s15, 3 }
  0x2d   : > { %v274_v1 = vsel %vm273_vm0, %v272_v0, 0.0  ;;  %550 = vrcp.f32 %v734_v2  ;;  %v548_v36 = vld [vmem:[%s240_s18] ss:$0 sm:$0xff]  ;;  %s342_s10 = scalar_lea.hbm %s925_s3, %s472_s24  ;;  %s271_s15 = scalar_lea.vmem [#allocation8], %s469_s21 }
  0x2e   : > { %275 = vadd.xlane.f32.xlu0 %v274_v1  ;;  %v549_v39 = vld [vmem:[%s231_s26] ss:$0 sm:$0xff]  ;;  %s344_s11 = sshll.u32 %s271_s15, 4  ;;  %s346_s23 = sshll.u32 %s342_s10, 4  ;;  %s345_s11 = int_to_ptr.vmem [resolvable:$true] %s344_s11  ;;  %s347_s23 = int_to_ptr.hbm [resolvable:$true] %s346_s23 }
  0x2f   : > { %s331_s4 = scalar_lea.sflag [#allocation4], %s858_s19  ;;  %s660_s5 = sshra.s32 %s347_s23, 4  ;;  %s661_s5 = int_to_ptr.hbm [resolvable:$true] %s660_s5 }
  0x30   : > { %s662_s6 = scalar_lea.hbm %s661_s5, 8  ;;  %s666_s8 = scalar_lea.hbm %s925_s3, 16 }
  0x31   : > { %p663_p4 = scmp.ne.s32.totalorder %s661_s5, %s662_s6  ;;  %p667_p7 = scmp.lt.s32.totalorder %s661_s5, %s925_s3 }
  0x32   : > { %p668_p8 = scmp.lt.s32.totalorder %s666_s8, %s662_s6 }
  0x33   : > { %v551_v3 = vpop.eup %550  ;;  %p664_p5 = pnand %p663_p4, %p810_p9 }
  0x34   : > { %v278_v4 = vmul.f32 32.0, %v551_v3  ;;  %vm282_vm1 = vweird.f32 %v551_v3  ;;  %p669_p10 = por %p668_p8, %p667_p7 }
  0x35   : > { %p665_p6 = pneg %p664_p5 }
  0x36   : > { %v279_v5 = vsub.f32 1.0, %v278_v4 }
  0x37   : > { %p670_p13 = pnand %p669_p10, %p665_p6 }
  0x38   : > { %v280_v6 = vmul.f32 %v551_v3, %v279_v5 }
  0x3a   : > { %v281_v7 = vadd.f32 %v551_v3, %v280_v6 }
  0x3c   : > { %v283_v8 = vsel %vm282_vm1, %v551_v3, %v281_v7 }
  0xa1   : > { %v276_v9 = vpop.xlane.xlu0 %275 }
  0xa2   : > { %v284_v10 = vmul.f32 %v283_v8, %v276_v9 }
  0xa4   : > { %v285_v11 = vsub.f32 %v272_v0, %v284_v10 }
  0xa6   : > { %v286_v12 = vmul.f32 %v285_v11, %v285_v11 }
  0xa8   : > { %v287_v13 = vsel %vm273_vm0, %v286_v12, 0.0 }
  0xa9   : > { %288 = vadd.xlane.f32.xlu0 %v287_v13 }
 0x11c   : > { %v289_v14 = vpop.xlane.xlu0 %288 }
 0x11d   : > { %v290_v15 = vmul.f32 0.032258064, %v289_v14 }
 0x11f   : > { %552 = vrsqrt.f32 %v290_v15  ;;  %vm298_vm2 = vcmp.eq.f32.partialorder %v290_v15, inf  ;;  %v301_v23 = vand.u32 2147483648, %v290_v15  ;;  %vm300_vm3 = vcmp.eq.f32.partialorder %v290_v15, 0.0 }
 0x125   : > { %v553_v16 = vpop.eup %552 }
 0x126   : > { %v292_v17 = vmul.f32 %v553_v16, %v290_v15 }
 0x128   : > { %v293_v18 = vmul.f32 %v553_v16, %v292_v17 }
 0x12a   : > { %v294_v19 = vmul.f32 0.5, %v293_v18 }
 0x12c   : > { %v295_v20 = vsub.f32 1.5, %v294_v19 }
 0x12e   : > { %v296_v21 = vmul.f32 %v553_v16, %v295_v20 }
 0x130   : > { %v297_v22 = vmul.f32 %v296_v21, %v290_v15 }
 0x132   : > { %v299_v24 = vsel %vm298_vm2, %v290_v15, %v297_v22 }
 0x133   : > { %v302_v25 = vsel %vm300_vm3, %v301_v23, %v299_v24 }
 0x134   : > { %v303_v26 = vadd.f32 1e-08, %v302_v25 }
 0x136   : > { %554 = vrcp.f32 %v303_v26  ;;  %v315_v30 = vand.u32 2147483648, %v303_v26  ;;  %v313_v32 = vand.u32 2147483647, %v303_v26  ;;  %vm309_vm5 = vweird.f32 %v303_v26 }
 0x138   : > { %v316_v34 = vor.u32 1.1754944e-38, %v315_v30  ;;  %vm314_vm7 = vcmp.eq.f32.partialorder %v313_v32, 8.507059e+37 }
 0x13c   : > { %v555_v27 = vpop.eup %554 }
 0x13d   : > { %v305_v28 = vmul.f32 %v555_v27, %v303_v26  ;;  %vm310_vm4 = vweird.f32 %v555_v27 }
 0x13e   : > { %vm311_vm6 = vmor %vm309_vm5, %vm310_vm4 }
 0x13f   : > { %v306_v29 = vsub.f32 1.0, %v305_v28 }
 0x141   : > { %v307_v31 = vmul.f32 %v555_v27, %v306_v29 }
 0x143   : > { %v308_v33 = vadd.f32 %v555_v27, %v307_v31 }
 0x145   : > { %v312_v35 = vsel %vm311_vm6, %v555_v27, %v308_v33 }
 0x146   : > { %v317_v37 = vsel %vm314_vm7, %v316_v34, %v312_v35 }
 0x147   : > { %v318_v38 = vmul.f32 %v317_v37, %v285_v11 }
 0x149   : > { %v324_v40 = vmul.f32 %v548_v36, %v318_v38 }
 0x14b   : > { %v328_v41 = vadd.f32 %v549_v39, %v324_v40 }
 0x14d   : > { %329 = vst.msk [vmem:[%s271_s15] sm:$0xff] %vm273_vm0, %v328_v41 }
 0x14e   : > { %673 = shalt.err (!%p670_p13)
}
 0x14f   : > { %481 = dma.vmem_to_hbm [thread:$0]  (%p810_p9), %s345_s11, 128, %s347_s23, %s331_s4  }
 0x150 PF: > { %s358_s19 = sand.u32 1, %s712_s12   ;;  %p494_p0 = pnand %p465_p12, %p817_p11 }
 0x151   : > { %s359_s22 = scalar_lea.sflag [#allocation4], %s358_s19 }
 0x152   : > { %p495_p1 = pneg %p494_p0 }
 0x154   : > { %707 = dma.done.wait (%p495_p1), %s359_s22, 128  }
 0x155   : > { %709 = vsyncadd (%p495_p1), %s359_s22, 4294967168  ;;  %s22_s17 = sadd.s32 1, %s732_s17   ;;  %s939_s1 = sld [smem:[#allocation12_spill]] }
 0x156   : > { %p19_p2 = scmp.ge.s32.totalorder %s22_s17, 4   ;;  %s940_s14 = sld [smem:[#allocation14_spill]] }
 0x157   : > { %s941_s25 = sld [smem:[#allocation13_spill]]  ;;  %s942_s12 = smov %s716_s13 }
 0x158   : > { %s944_s15 = smov %s728_s16 }
 0x159   :  { %21 = sbr.rel (!%p19_p2) target bundleno = 10 (0xa), region = 101 }
 0x15b   : > { %s943_s13 = smov %s939_s1 }
 0x15d   : > { %s945_s16 = smov %s941_s25 }
 0x15e   :  { %365 = vsyncpa [#allocation3], 1 }
 0x15f   :  { %367 = vsyncpa [#allocation3 + $0x1], 1 }
 0x160   :  { %368 = vsyncpa [#allocation6], 1 }
 0x161   :  { %370 = vsyncpa [#allocation6 + $0x1], 1 }
 0x162   :  { %371 = vsyncpa [#allocation4], 1 }
 0x163   :  { %373 = vsyncpa [#allocation4 + $0x1], 1 }

</bundles_post_ra>
